<compile_context>
chip_gen: v5e
topology: v5e:2x2
jax: 0.10.0
libtpu: 0.0.40
codegen_flags: <defaults>
</compile_context>

<pallas_src>
import functools

import jax
import jax.numpy as jnp
from jax.experimental import pallas as pl
from jax.experimental.pallas import tpu as pltpu

REPARAM_NOISE = 1e-6
LANE = 128
SUBLANE = 8
MAX_TILE_ROWS = 512            # >=512-row batch tiles once B grows


def _round_up(x, m):
    return ((x + m - 1) // m) * m


def _actor_fwd_kernel(x_ref, p_ref, out_ref, *, in_dim, width,
                      off_w1, off_b1, off_w2, off_b2, off_wh, off_bh,
                      off_lo, off_hi):
    x = x_ref[...]                                    # (TB, in_dim)

    # Static, sublane-aligned views into the packed parameter slab.
    w1 = p_ref[off_w1:off_w1 + in_dim, :]             # (in_dim, width)
    b1 = p_ref[off_b1:off_b1 + 1, :]                  # (1, width)
    w2 = p_ref[off_w2:off_w2 + width, :]              # (width, width)
    b2 = p_ref[off_b2:off_b2 + 1, :]                  # (1, width)
    wh = p_ref[off_wh:off_wh + width, :]              # fused mu||sigma head
    bh = p_ref[off_bh:off_bh + 1, :]                  # (1, width)
    lo = p_ref[off_lo:off_lo + 1, :]                  # per-column lower bound
    hi = p_ref[off_hi:off_hi + 1, :]                  # per-column upper bound

    # fc1 + relu
    h1 = jnp.dot(x, w1, preferred_element_type=jnp.float32) + b1
    h1 = jnp.maximum(h1, 0.0)

    # fc2 + relu
    h2 = jnp.dot(h1, w2, preferred_element_type=jnp.float32) + b2
    h2 = jnp.maximum(h2, 0.0)

    # fused heads: one MXU pass produces [mu | sigma | zero-pad]
    heads = jnp.dot(h2, wh, preferred_element_type=jnp.float32) + bh

    # mu columns:    clip to [-inf, +inf]  -> pass-through
    # sigma columns: clip to [1e-6, 1.0]
    # pad columns:   clip to [0, 0]        -> stay exactly zero
    out_ref[...] = jnp.clip(heads, lo, hi).astype(out_ref.dtype)


def pack_actor_params(params):
    """Fuse the mu/sigma heads, bake per-column clamp bounds, and pack all
    weights/biases into one lane-dense (multiple-of-128 wide) f32 slab.

    Returns (slab, meta).  Row offsets are aligned to the 8-sublane tile so
    in-kernel slices are tile-aligned views."""
    w1, b1, w2, b2, wmu, bmu, ws, bs = params
    in_dim, fc1 = w1.shape
    _, fc2 = w2.shape
    n_actions = wmu.shape[1]
    # Lane-dense width: biggest single measured lever (unmasked vst).
    width = _round_up(max(fc1, fc2, 2 * n_actions, LANE), LANE)

    wh = jnp.concatenate([wmu, ws], axis=1)           # (fc2, 2*n_actions)
    bh = jnp.concatenate([bmu, bs], axis=1)           # (1, 2*n_actions)

    # Per-column clamp bounds (replaces in-kernel iota/compare/select).
    col = jnp.arange(width)
    is_mu = col < n_actions
    is_sigma = (col >= n_actions) & (col < 2 * n_actions)
    lo = jnp.where(is_mu, -jnp.inf,
                   jnp.where(is_sigma, jnp.float32(REPARAM_NOISE), 0.0))
    hi = jnp.where(is_mu, jnp.inf,
                   jnp.where(is_sigma, jnp.float32(1.0), 0.0))
    lo = lo.reshape(1, width).astype(jnp.float32)
    hi = hi.reshape(1, width).astype(jnp.float32)

    def pad2d(m, rows, cols):
        r, c = m.shape
        return jnp.pad(m.astype(jnp.float32), ((0, rows - r), (0, cols - c)))

    blocks = [
        pad2d(w1, in_dim, width),
        pad2d(b1, 1, width),
        pad2d(w2, width, width),
        pad2d(b2, 1, width),
        pad2d(wh, width, width),
        pad2d(bh, 1, width),
        lo,
        hi,
    ]
    offsets = []
    off = 0
    for blk in blocks:
        offsets.append(off)
        off = _round_up(off + blk.shape[0], SUBLANE)
    total_rows = _round_up(off, SUBLANE)

    slab = jnp.zeros((total_rows, width), jnp.float32)
    for o, blk in zip(offsets, blocks):
        slab = slab.at[o:o + blk.shape[0], :].set(blk)

    meta = dict(in_dim=in_dim, n_actions=n_actions, width=width,
                slab_rows=total_rows,
                off_w1=offsets[0], off_b1=offsets[1],
                off_w2=offsets[2], off_b2=offsets[3],
                off_wh=offsets[4], off_bh=offsets[5],
                off_lo=offsets[6], off_hi=offsets[7])
    return slab, meta


def make_actor_forward(meta, *, max_tile_rows=MAX_TILE_ROWS):
    """Build a jitted forward(state, slab) -> (mu, sigma)."""
    n_actions = meta["n_actions"]
    width = meta["width"]
    in_dim = meta["in_dim"]
    slab_rows = meta["slab_rows"]

    kernel_kwargs = {k: meta[k] for k in
                     ("in_dim", "width",
                      "off_w1", "off_b1", "off_w2", "off_b2",
                      "off_wh", "off_bh", "off_lo", "off_hi")}
    kernel = functools.partial(_actor_fwd_kernel, **kernel_kwargs)

    @jax.jit
    def forward(state, slab):
        B = state.shape[0]
        state = state.astype(jnp.float32)

        # Tile the batch: whole (8-row-aligned) batch in one tile when small,
        # 512-row tiles when large.  Zero-pad ragged batches (sliced off below).
        if B <= max_tile_rows:
            tb = _round_up(max(B, 1), SUBLANE)
        else:
            tb = max_tile_rows
        bp = _round_up(B, tb)
        if bp != B:
            state = jnp.pad(state, ((0, bp - B), (0, 0)))
        grid = (bp // tb,)

        flops = 2 * bp * (in_dim * width + 2 * width * width)
        bytes_accessed = 4 * (bp * in_dim + slab_rows * width + bp * width)

        out = pl.pallas_call(
            kernel,
            out_shape=jax.ShapeDtypeStruct((bp, width), jnp.float32),
            grid=grid,
            in_specs=[
                # per-tile batch slice of the state
                pl.BlockSpec((tb, in_dim), lambda i: (i, 0)),
                # constant index_map -> slab stays VMEM-resident across tiles
                pl.BlockSpec((slab_rows, width), lambda i: (0, 0)),
            ],
            out_specs=pl.BlockSpec((tb, width), lambda i: (i, 0)),
            compiler_params=pltpu.CompilerParams(
                # v7x: shard batch tiles across both TensorCores; harmless on
                # single-TC v5e/v6e.
                dimension_semantics=("parallel",),
                # past v5e's 16 MiB scoped default, under v7x's 64 MiB physical
                vmem_limit_bytes=32 * 1024 * 1024,
            ),
            cost_estimate=pl.CostEstimate(
                flops=flops, transcendentals=0, bytes_accessed=bytes_accessed),
        )(state, slab)

        mu = out[:B, :n_actions]
        sigma = out[:B, n_actions:2 * n_actions]
        return mu, sigma

    return forward


def init_actor_params(key, input_dim, fc1_dims, fc2_dims, n_actions):
    """Deterministic init mimicking PyTorch nn.Linear default
    (uniform in [-1/sqrt(fan_in), 1/sqrt(fan_in)]). Weights stored as [in, out]."""
    def linear(key, fan_in, fan_out):
        kw, kb = jax.random.split(key)
        bound = 1.0 / jnp.sqrt(float(fan_in))
        w = jax.random.uniform(kw, (fan_in, fan_out), jnp.float32, -bound, bound)
        b = jax.random.uniform(kb, (1, fan_out), jnp.float32, -bound, bound)
        return w, b

    k1, k2, k3, k4 = jax.random.split(key, 4)
    w1, b1 = linear(k1, input_dim, fc1_dims)
    w2, b2 = linear(k2, fc1_dims, fc2_dims)
    wmu, bmu = linear(k3, fc2_dims, n_actions)
    ws, bs = linear(k4, fc2_dims, n_actions)
    return (w1, b1, w2, b2, wmu, bmu, ws, bs)


def actor_forward_ref(state, params):
    """Pure-JAX reference (unpacked params) for correctness checking."""
    w1, b1, w2, b2, wmu, bmu, ws, bs = params
    h1 = jnp.maximum(state @ w1 + b1, 0.0)
    h2 = jnp.maximum(h1 @ w2 + b2, 0.0)
    mu = h2 @ wmu + bmu
    sigma = jnp.clip(h2 @ ws + bs, REPARAM_NOISE, 1.0)
    return mu, sigma


if __name__ == "__main__":
    key = jax.random.PRNGKey(0)
    k_params, k_state, k_state2 = jax.random.split(key, 3)

    # Small shapes consistent with the module: input_dims=(8,), fc1=32, fc2=32,
    # n_actions=4, batch=8.
    B, input_dim, fc1_dims, fc2_dims, n_actions = 8, 8, 32, 32, 4

    params = init_actor_params(k_params, input_dim, fc1_dims, fc2_dims, n_actions)
    state = jax.random.normal(k_state, (B, input_dim), jnp.float32)

    slab, meta = pack_actor_params(params)
    forward = make_actor_forward(meta)

    mu, sigma = forward(state, slab)
    jax.block_until_ready((mu, sigma))

    mu_ref, sigma_ref = actor_forward_ref(state, params)
    assert mu.shape == (B, n_actions) and sigma.shape == (B, n_actions)
    assert jnp.allclose(mu, mu_ref, atol=1e-5, rtol=1e-5)
    assert jnp.allclose(sigma, sigma_ref, atol=1e-5, rtol=1e-5)

    # Range check against the float32 clamp bound: float32(1e-6) is slightly
    # below the Python double 1e-6.
    eps32 = float(jnp.float32(REPARAM_NOISE))
    assert float(sigma.min()) >= eps32
    assert float(sigma.max()) <= 1.0

    # Second check exercising the batch-grid path (grid > 1, ragged batch).
    B2 = 600
    state2 = jax.random.normal(k_state2, (B2, input_dim), jnp.float32)
    mu2, sigma2 = forward(state2, slab)
    jax.block_until_ready((mu2, sigma2))
    mu2_ref, sigma2_ref = actor_forward_ref(state2, params)
    assert mu2.shape == (B2, n_actions) and sigma2.shape == (B2, n_actions)
    assert jnp.allclose(mu2, mu2_ref, atol=1e-5, rtol=1e-5)
    assert jnp.allclose(sigma2, sigma2_ref, atol=1e-5, rtol=1e-5)

    print("KERNEL_OK")
</pallas_src>

<mosaic_0001>
module attributes {stable_mosaic.version = 11 : i64} {
  func.func @_actor_fwd_kernel(%arg0: i32, %arg1: memref<8x8xf32, #tpu.memory_space<vmem>>, %arg2: memref<304x128xf32, #tpu.memory_space<vmem>>, %arg3: memref<8x128xf32, #tpu.memory_space<vmem>>) attributes {dimension_semantics = [#tpu.dimension_semantics<parallel>], iteration_bounds = array<i64: 1>, scalar_prefetch = 0 : i64, scratch_operands = 0 : i64, tpu.core_type = #tpu.core_type<tc>, window_params = [{transform_indices = @transform_0, window_bounds = array<i64: 8, 8>}, {pipeline_mode = #tpu.pipeline_mode<synchronous>, transform_indices = @transform_1, window_bounds = array<i64: 304, 128>}, {transform_indices = @transform_2, window_bounds = array<i64: 8, 128>}]} {
    %c0 = arith.constant 0 : index
    %c0_0 = arith.constant 0 : index
    %0 = vector.load %arg1[%c0, %c0_0] : memref<8x8xf32, #tpu.memory_space<vmem>>, vector<8x8xf32>
    %c0_1 = arith.constant 0 : index
    %c0_2 = arith.constant 0 : index
    %1 = vector.load %arg2[%c0_1, %c0_2] : memref<304x128xf32, #tpu.memory_space<vmem>>, vector<8x128xf32>
    %c8 = arith.constant 8 : index
    %c0_3 = arith.constant 0 : index
    %2 = vector.load %arg2[%c8, %c0_3] : memref<304x128xf32, #tpu.memory_space<vmem>>, vector<1x128xf32>
    %c16 = arith.constant 16 : index
    %c0_4 = arith.constant 0 : index
    %3 = vector.load %arg2[%c16, %c0_4] : memref<304x128xf32, #tpu.memory_space<vmem>>, vector<128x128xf32>
    %c144 = arith.constant 144 : index
    %c0_5 = arith.constant 0 : index
    %4 = vector.load %arg2[%c144, %c0_5] : memref<304x128xf32, #tpu.memory_space<vmem>>, vector<1x128xf32>
    %c152 = arith.constant 152 : index
    %c0_6 = arith.constant 0 : index
    %5 = vector.load %arg2[%c152, %c0_6] : memref<304x128xf32, #tpu.memory_space<vmem>>, vector<128x128xf32>
    %c280 = arith.constant 280 : index
    %c0_7 = arith.constant 0 : index
    %6 = vector.load %arg2[%c280, %c0_7] : memref<304x128xf32, #tpu.memory_space<vmem>>, vector<1x128xf32>
    %c288 = arith.constant 288 : index
    %c0_8 = arith.constant 0 : index
    %7 = vector.load %arg2[%c288, %c0_8] : memref<304x128xf32, #tpu.memory_space<vmem>>, vector<1x128xf32>
    %c296 = arith.constant 296 : index
    %c0_9 = arith.constant 0 : index
    %8 = vector.load %arg2[%c296, %c0_9] : memref<304x128xf32, #tpu.memory_space<vmem>>, vector<1x128xf32>
    %cst = arith.constant dense<0.000000e+00> : vector<8x128xf32>
    %9 = tpu.matmul %0, %1, %cst {dimension_numbers = #tpu.dot_dimension_numbers<[1], [0], [0], [1], [0, 0, 1, 1], [], []>} : vector<8x8xf32>, vector<8x128xf32>, vector<8x128xf32> -> vector<8x128xf32>
    %10 = vector.broadcast %2 : vector<1x128xf32> to vector<8x128xf32>
    %11 = arith.addf %9, %10 : vector<8x128xf32>
    %cst_10 = arith.constant 0.000000e+00 : f32
    %12 = vector.broadcast %cst_10 : f32 to vector<8x128xf32>
    %13 = arith.maximumf %11, %12 : vector<8x128xf32>
    %cst_11 = arith.constant dense<0.000000e+00> : vector<8x128xf32>
    %14 = tpu.matmul %13, %3, %cst_11 {dimension_numbers = #tpu.dot_dimension_numbers<[1], [0], [0], [1], [0, 0, 1, 1], [], []>} : vector<8x128xf32>, vector<128x128xf32>, vector<8x128xf32> -> vector<8x128xf32>
    %15 = vector.broadcast %4 : vector<1x128xf32> to vector<8x128xf32>
    %16 = arith.addf %14, %15 : vector<8x128xf32>
    %cst_12 = arith.constant 0.000000e+00 : f32
    %17 = vector.broadcast %cst_12 : f32 to vector<8x128xf32>
    %18 = arith.maximumf %16, %17 : vector<8x128xf32>
    %cst_13 = arith.constant dense<0.000000e+00> : vector<8x128xf32>
    %19 = tpu.matmul %18, %5, %cst_13 {dimension_numbers = #tpu.dot_dimension_numbers<[1], [0], [0], [1], [0, 0, 1, 1], [], []>} : vector<8x128xf32>, vector<128x128xf32>, vector<8x128xf32> -> vector<8x128xf32>
    %20 = vector.broadcast %6 : vector<1x128xf32> to vector<8x128xf32>
    %21 = arith.addf %19, %20 : vector<8x128xf32>
    %22 = vector.broadcast %7 : vector<1x128xf32> to vector<8x128xf32>
    %23 = arith.maximumf %22, %21 : vector<8x128xf32>
    %24 = vector.broadcast %8 : vector<1x128xf32> to vector<8x128xf32>
    %25 = arith.minimumf %24, %23 : vector<8x128xf32>
    %c0_14 = arith.constant 0 : index
    %c0_15 = arith.constant 0 : index
    %26 = vector.load %arg3[%c0_14, %c0_15] : memref<8x128xf32, #tpu.memory_space<vmem>>, vector<8x128xf32>
    tpu.vector_store %arg3[%c0_14, %c0_15], %25 {strides = array<i32>} : memref<8x128xf32, #tpu.memory_space<vmem>>, vector<8x128xf32>,
    return
  }
  func.func @transform_0(%arg0: i32) -> (i32, i32) {
    %c0_i32 = arith.constant 0 : i32
    %c0_i32_0 = arith.constant 0 : i32
    return %arg0, %c0_i32 : i32, i32
  }
  func.func @transform_1(%arg0: i32) -> (i32, i32) {
    %c0_i32 = arith.constant 0 : i32
    %c0_i32_0 = arith.constant 0 : i32
    %c0_i32_1 = arith.constant 0 : i32
    return %c0_i32, %c0_i32_0 : i32, i32
  }
  func.func @transform_2(%arg0: i32) -> (i32, i32) {
    %c0_i32 = arith.constant 0 : i32
    %c0_i32_0 = arith.constant 0 : i32
    return %arg0, %c0_i32 : i32, i32
  }
}

</mosaic_0001>

<bundles_post_ra>
// kernel: forward.1
= control target key start
LH: loop header
LB: loop body
LE: loop exit
PB: predicated region body
PF: predicated region fallthrough
CT: control target
= control target key end

     0   :  { %7 = vsyncpa [#allocation3], 0  ;;  %s250_s0 = inlined_call_operand.hbm [shape: f32[8,8], index: 0, kind: input, shape index: {}]   ;;  %s251_s1 = inlined_call_operand.hbm [shape: f32[304,128], index: 1, kind: input, shape index: {}]   ;;  %s252_s2 = inlined_call_operand.vmem [shape: f32[8,128], index: 2, kind: output, shape index: {}]  }
   0x1   :  { %s14_s11 = sshll.u32 %s250_s0, 4  ;;  %s15_s11 = int_to_ptr.hbm [resolvable:$true] %s14_s11 }
   0x2   :  { %8 = vsyncpa [#allocation5], 0  ;;  %s222_s12 = smov [#allocation2]   ;;  %s24_s16 = sshll.u32 %s251_s1, 4  ;;  %s25_s16 = int_to_ptr.hbm [resolvable:$true] %s24_s16 }
   0x3   :  { %s16_s13 = sshll.u32 %s222_s12, 4  ;;  %s223_s17 = smov [#allocation4]   ;;  %s17_s13 = int_to_ptr.vmem [resolvable:$true] %s16_s13 }
   0x4   :  { %19 = dma.hbm_to_vmem [thread:$0]  %s15_s11, 128, %s17_s13, [#allocation3]  }
   0x5   :  { %s26_s18 = sshll.u32 %s223_s17, 4  ;;  %s224_s19 = smov 128   ;;  %s27_s18 = int_to_ptr.vmem [resolvable:$true] %s26_s18 }
   0x6   :  { %s225_s20 = smov 8  }
   0x7   :  { %32 = dma.hbm_to_vmem [thread:$0]  %s25_s16, 4864, %s27_s18, [#allocation5], %s224_s19, %s224_s19, %s225_s20  }
   0x8   :  { %218 = dma.done.wait [#allocation3], 128  }
   0x9   :  { %219 = vsyncadd [#allocation3], 4294967168 }
   0xa   :  { %220 = dma.done.wait [#allocation5], 4864  }
   0xb   :  { %221 = vsyncadd [#allocation5], 4294962432  ;;  %vm81_vm0 = vcmask 64512   ;;  %v42_v0 = vld [vmem:[#allocation4] sm:$0xff]  ;;  %v41_v1 = vld [vmem:[#allocation2] sm:$0xff] }
   0xc   :  { %v59_v2 = vld [vmem:[#allocation4 + $0x88] sm:$0xff]  ;;  %100 = vmatpush.msra.mxu0 %v42_v0  ;;  %v58_v3 = vld [vmem:[#allocation4 + $0x80] sm:$0xff]  ;;  %v57_v4 = vld [vmem:[#allocation4 + $0x78] sm:$0xff] }
   0xd   :  { %107 = vmatpush.msra.mxu1 %v59_v2  ;;  %160 = vmatmul.msk.f32.vlgmr.msra.gmra.mxu0 %vm81_vm0, %v41_v1  ;;  %v56_v5 = vld [vmem:[#allocation4 + $0x70] sm:$0xff]  ;;  %v55_v6 = vld [vmem:[#allocation4 + $0x68] sm:$0xff]  ;;  %v54_v7 = vld [vmem:[#allocation4 + $0x60] sm:$0xff] }
   0xe   :  { %v53_v8 = vld [vmem:[#allocation4 + $0x58] sm:$0xff]  ;;  %v52_v9 = vld [vmem:[#allocation4 + $0x50] sm:$0xff]  ;;  %v51_v10 = vld [vmem:[#allocation4 + $0x48] sm:$0xff] }
   0xf   :  { %108 = vmatpush.msra.mxu1 %v58_v3  ;;  %v50_v11 = vld [vmem:[#allocation4 + $0x40] sm:$0xff]  ;;  %v49_v12 = vld [vmem:[#allocation4 + $0x38] sm:$0xff]  ;;  %v48_v13 = vld [vmem:[#allocation4 + $0x30] sm:$0xff] }
  0x10   :  { %v47_v14 = vld [vmem:[#allocation4 + $0x28] sm:$0xff]  ;;  %v46_v15 = vld [vmem:[#allocation4 + $0x20] sm:$0xff]  ;;  %v45_v16 = vld [vmem:[#allocation4 + $0x18] sm:$0xff] }
  0x11   :  { %109 = vmatpush.msra.mxu1 %v57_v4  ;;  %v44_v17 = vld [vmem:[#allocation4 + $0x10] sm:$0xff]  ;;  %v75_v19 = vld [vmem:[#allocation4 + $0x108] sm:$0xff]  ;;  %v74_v20 = vld [vmem:[#allocation4 + $0x100] sm:$0xff] }
  0x12   :  { %v76_v18 = vld [vmem:[#allocation4 + $0x110] sm:$0xff]  ;;  %v73_v21 = vld [vmem:[#allocation4 + $0xf8] sm:$0xff]  ;;  %v71_v23 = vld [vmem:[#allocation4 + $0xe8] sm:$0xff] }
  0x13   :  { %110 = vmatpush.msra.mxu1 %v56_v5  ;;  %129 = vmatpush.msra.mxu2 %v76_v18  ;;  %v72_v22 = vld [vmem:[#allocation4 + $0xf0] sm:$0xff]  ;;  %v70_v24 = vld [vmem:[#allocation4 + $0xe0] sm:$0xff]  ;;  %v69_v25 = vld [vmem:[#allocation4 + $0xd8] sm:$0xff] }
  0x14   :  { %v68_v26 = vld [vmem:[#allocation4 + $0xd0] sm:$0xff]  ;;  %v67_v27 = vld [vmem:[#allocation4 + $0xc8] sm:$0xff]  ;;  %v66_v28 = vld [vmem:[#allocation4 + $0xc0] sm:$0xff] }
  0x15   :  { %111 = vmatpush.msra.mxu1 %v55_v6  ;;  %130 = vmatpush.msra.mxu2 %v75_v19  ;;  %v65_v29 = vld [vmem:[#allocation4 + $0xb8] sm:$0xff]  ;;  %v64_v30 = vld [vmem:[#allocation4 + $0xb0] sm:$0xff]  ;;  %v165_v31 = vld [vmem:[#allocation4 + $0x8] ss:$0 sm:$0xff] }
  0x16   :  { %v63_v35 = vld [vmem:[#allocation4 + $0xa8] sm:$0xff]  ;;  %v62_v36 = vld [vmem:[#allocation4 + $0xa0] sm:$0xff]  ;;  %v61_v37 = vld [vmem:[#allocation4 + $0x98] sm:$0xff] }
  0x17   :  { %112 = vmatpush.msra.mxu1 %v54_v7  ;;  %131 = vmatpush.msra.mxu2 %v74_v20  ;;  %v166_v38 = vld [vmem:[#allocation4 + $0x90] ss:$0 sm:$0xff]  ;;  %v167_v42 = vld [vmem:[#allocation4 + $0x118] ss:$0 sm:$0xff]  ;;  %v168_v43 = vld [vmem:[#allocation4 + $0x120] ss:$0 sm:$0xff] }
  0x18   :  { %v169_v46 = vld [vmem:[#allocation4 + $0x128] ss:$0 sm:$0xff] }
  0x19   :  { %113 = vmatpush.msra.mxu1 %v53_v8  ;;  %132 = vmatpush.msra.mxu2 %v73_v21 }
  0x1b   :  { %114 = vmatpush.msra.mxu1 %v52_v9  ;;  %133 = vmatpush.msra.mxu2 %v72_v22 }
  0x1d   :  { %115 = vmatpush.msra.mxu1 %v51_v10  ;;  %134 = vmatpush.msra.mxu2 %v71_v23 }
  0x1f   :  { %116 = vmatpush.msra.mxu1 %v50_v11  ;;  %135 = vmatpush.msra.mxu2 %v70_v24 }
  0x21   :  { %117 = vmatpush.msra.mxu1 %v49_v12  ;;  %136 = vmatpush.msra.mxu2 %v69_v25 }
  0x23   :  { %118 = vmatpush.msra.mxu1 %v48_v13  ;;  %137 = vmatpush.msra.mxu2 %v68_v26 }
  0x25   :  { %119 = vmatpush.msra.mxu1 %v47_v14  ;;  %138 = vmatpush.msra.mxu2 %v67_v27 }
  0x27   :  { %120 = vmatpush.msra.mxu1 %v46_v15  ;;  %139 = vmatpush.msra.mxu2 %v66_v28 }
  0x29   :  { %121 = vmatpush.msra.mxu1 %v45_v16  ;;  %140 = vmatpush.msra.mxu2 %v65_v29 }
  0x2b   :  { %122 = vmatpush.msra.mxu1 %v44_v17  ;;  %141 = vmatpush.msra.mxu2 %v64_v30 }
  0x2d   :  { %142 = vmatpush.msra.mxu2 %v63_v35 }
  0x2f   :  { %143 = vmatpush.msra.mxu2 %v62_v36 }
  0x31   :  { %144 = vmatpush.msra.mxu2 %v61_v37 }
  0x8a   :  { %v102_v32 = vpop.f32.mrf.mxu0 }
  0x8b   :  { %v103_v33 = vadd.f32 %v165_v31, %v102_v32 }
  0x8d   :  { %v105_v34 = vmax.f32 %v103_v33, 0.0 }
  0x8f   :  { %123 = vmatmul.f32.vlgmr.msra.gmra.mxu1 %v105_v34 }
 0x10c   :  { %v124_v39 = vpop.f32.mrf.mxu1 }
 0x10d   :  { %v125_v40 = vadd.f32 %v166_v38, %v124_v39 }
 0x10f   :  { %v127_v41 = vmax.f32 %v125_v40, 0.0 }
 0x111   :  { %145 = vmatmul.f32.vlgmr.msra.gmra.mxu2 %v127_v41 }
 0x194   :  { %v146_v44 = vpop.f32.mrf.mxu2 }
 0x195   :  { %v147_v45 = vadd.f32 %v167_v42, %v146_v44 }
 0x197   :  { %v150_v47 = vmax.f32 %v168_v43, %v147_v45 }
 0x199   :  { %v152_v48 = vmin.f32 %v169_v46, %v150_v47 }
 0x19b   :  { %153 = vst [vmem:[%s252_s2] sm:$0xff] %v152_v48 }
 0x19c   :  { %158 = vsyncpa [#allocation3], 1 }
 0x19d   :  { %159 = vsyncpa [#allocation5], 1 }

</bundles_post_ra>
